<compile_context>
chip_gen: v7x
topology: tpu7x:2x2x1
jax: 0.10.0
libtpu: 0.0.40
codegen_flags: <defaults>
</compile_context>

<pallas_src>
import functools

import jax
import jax.numpy as jnp
from jax.experimental import pallas as pl
from jax.experimental.pallas import tpu as pltpu


_LANES = 128    # vreg lane width; spatial chunk width for accumulation
_C_SLAB = 64    # channel rows held in registers between scratch/output flushes


def _pool_kernel_single(x_ref, o_ref, *, inv_s):
    """Whole spatial extent resident: x_ref (bt, C, S) -> o_ref (bt, C, 2).

    Per (batch, channel-slab): accumulate 128-lane chunks purely in registers
    (VPU add/max), one XLU reduce at the end, exact-width tail read for ragged
    S (no masking, no scratch, no grid carry).
    """
    bt, C, S = x_ref.shape
    n_full = S // _LANES
    rem = S - n_full * _LANES

    for b in range(bt):
        for c0 in range(0, C, _C_SLAB):
            rows = min(_C_SLAB, C - c0)
            rsl = pl.ds(c0, rows)
            if n_full > 0:
                run_sum = jnp.zeros((rows, _LANES), jnp.float32)
                run_max = jnp.full((rows, _LANES), -jnp.inf, jnp.float32)
                for j in range(n_full):
                    chunk = x_ref[b, rsl, pl.ds(j * _LANES, _LANES)].astype(jnp.float32)
                    run_sum = run_sum + chunk
                    run_max = jnp.maximum(run_max, chunk)
                sum_col = jnp.sum(run_sum, axis=-1, keepdims=True)
                max_col = jnp.max(run_max, axis=-1, keepdims=True)
            else:
                sum_col = jnp.zeros((rows, 1), jnp.float32)
                max_col = jnp.full((rows, 1), -jnp.inf, jnp.float32)
            if rem > 0:
                tail = x_ref[b, rsl, pl.ds(n_full * _LANES, rem)].astype(jnp.float32)
                sum_col = sum_col + jnp.sum(tail, axis=-1, keepdims=True)
                max_col = jnp.maximum(max_col, jnp.max(tail, axis=-1, keepdims=True))
            o_ref[b, rsl, :] = jnp.concatenate([sum_col * inv_s, max_col], axis=1)


def _pool_kernel_multi(x_ref, o_ref, sum_acc, max_acc, *,
                       s_tile, s_total, n_s, need_mask, inv_s):
    """Streamed spatial reduction: grid = (B, n_s); x_ref (1, C, s_tile).

    Scratch is read once and written once per channel slab per grid step; the
    chunk loop only touches registers (1 vld + add/max per data vreg).
    """
    C = x_ref.shape[1]
    s = pl.program_id(1)
    n_chunks = s_tile // _LANES

    @pl.when(s == 0)
    def _init():
        sum_acc[...] = jnp.zeros(sum_acc.shape, sum_acc.dtype)
        max_acc[...] = jnp.full(max_acc.shape, -jnp.inf, max_acc.dtype)

    def accumulate(last_tile):
        # `last_tile` is a static Python bool, so the chunk base is a static
        # integer: fully out-of-range chunks are skipped at trace time and only
        # the single straddling chunk pays for the iota + selects.
        for c0 in range(0, C, _C_SLAB):
            rows = min(_C_SLAB, C - c0)
            rsl = pl.ds(c0, rows)
            run_sum = sum_acc[rsl, :]
            run_max = max_acc[rsl, :]
            for j in range(n_chunks):
                if last_tile:
                    base = (n_s - 1) * s_tile + j * _LANES
                    if base >= s_total:
                        continue                      # fully out of range: skip
                chunk = x_ref[0, rsl, pl.ds(j * _LANES, _LANES)].astype(jnp.float32)
                if last_tile and base + _LANES > s_total:   # straddling chunk
                    lane = jax.lax.broadcasted_iota(jnp.int32, chunk.shape, 1)
                    valid = (base + lane) < s_total
                    run_sum = run_sum + jnp.where(valid, chunk, 0.0)
                    run_max = jnp.maximum(run_max, jnp.where(valid, chunk, -jnp.inf))
                else:
                    run_sum = run_sum + chunk
                    run_max = jnp.maximum(run_max, chunk)
            sum_acc[rsl, :] = run_sum
            max_acc[rsl, :] = run_max

    if need_mask:
        pl.when(s < n_s - 1)(lambda: accumulate(False))
        pl.when(s == n_s - 1)(lambda: accumulate(True))
    else:
        accumulate(False)

    @pl.when(s == n_s - 1)
    def _epilogue():
        for c0 in range(0, C, _C_SLAB):
            rows = min(_C_SLAB, C - c0)
            rsl = pl.ds(c0, rows)
            avg_col = jnp.sum(sum_acc[rsl, :], axis=-1, keepdims=True) * inv_s
            max_col = jnp.max(max_acc[rsl, :], axis=-1, keepdims=True)
            o_ref[0, rsl, :] = jnp.concatenate([avg_col, max_col], axis=1)


def _choose_s_tile(s_total, channels, itemsize, target_bytes):
    """Pick a streaming tile: multiple of 128 lanes, ~target_bytes per x block."""
    max_lanes = (target_bytes // max(1, channels * itemsize)) // _LANES * _LANES
    max_lanes = int(max(_LANES, min(2048, max_lanes)))
    if s_total % _LANES == 0:
        tile = min(max_lanes, s_total)
        while s_total % tile != 0:    # prefer an exact divisor (no masking)
            tile -= _LANES
        return tile
    return min(max_lanes, max(_LANES, (s_total // _LANES) * _LANES))


def channel_attention(x, fc1_w, fc2_w, *, s_tile=None, block_bytes=2 * 1024 * 1024):
    """x: (B, C, H, W) NCHW. fc1_w: (C//r, C), fc2_w: (C, C//r) (PyTorch Linear layout)."""
    B, C, H, W = x.shape
    S = H * W
    x_flat = x.reshape(B, C, S)
    itemsize = x_flat.dtype.itemsize
    per_batch_bytes = C * S * itemsize
    inv_s = 1.0 / float(S)

    single_tile = (s_tile is None
                   and per_batch_bytes <= block_bytes
                   and pl.cdiv(S, _LANES) <= 32)

    if single_tile:
        # Block several batch elements per step, but keep >= 2 grid steps so the
        # megacore-parallel axis stays populated on v7x.
        bt = 1
        for cand in range(B, 0, -1):
            if B % cand != 0:
                continue
            if cand * per_batch_bytes > block_bytes:
                continue
            if cand > 1 and B // cand < 2:
                continue
            bt = cand
            break
        kernel = functools.partial(_pool_kernel_single, inv_s=inv_s)
        grid = (B // bt,)
        in_specs = [pl.BlockSpec((bt, C, S), lambda b: (b, 0, 0))]
        out_specs = pl.BlockSpec((bt, C, 2), lambda b: (b, 0, 0))
        scratch_shapes = []
        dims = ("parallel",)
    else:
        if s_tile is None:
            s_tile = _choose_s_tile(S, C, itemsize, block_bytes)
        s_tile = min(s_tile, S)
        if s_tile % _LANES != 0:
            raise ValueError("s_tile must be a multiple of 128 for the streaming path")
        n_s = pl.cdiv(S, s_tile)
        need_mask = (n_s * s_tile) != S
        kernel = functools.partial(_pool_kernel_multi, s_tile=s_tile, s_total=S,
                                   n_s=n_s, need_mask=need_mask, inv_s=inv_s)
        grid = (B, n_s)
        in_specs = [pl.BlockSpec((1, C, s_tile), lambda b, s: (b, 0, s))]
        out_specs = pl.BlockSpec((1, C, 2), lambda b, s: (b, 0, 0))
        scratch_shapes = [pltpu.VMEM((C, _LANES), jnp.float32),   # running sum
                          pltpu.VMEM((C, _LANES), jnp.float32)]   # running max
        dims = ("parallel", "arbitrary")

    pooled = pl.pallas_call(
        kernel,
        out_shape=jax.ShapeDtypeStruct((B, C, 2), jnp.float32),
        grid_spec=pltpu.PrefetchScalarGridSpec(
            num_scalar_prefetch=0,
            grid=grid,
            in_specs=in_specs,
            out_specs=out_specs,
            scratch_shapes=scratch_shapes),
        compiler_params=pltpu.CompilerParams(
            dimension_semantics=dims,
            vmem_limit_bytes=32 * 1024 * 1024),
    )(x_flat)

    # Tiny squeeze-excite MLP, hoisted out of the kernel: one batched matmul
    # pair over {avg, max} x all batch elements (proper MXU shape in XLA).
    stats = jnp.moveaxis(pooled, 2, 1).reshape(2 * B, C)              # rows: b0_avg, b0_max, ...
    h = jnp.maximum(stats @ fc1_w.astype(jnp.float32).T, 0.0)         # (2B, C//r)
    y = (h @ fc2_w.astype(jnp.float32).T).reshape(B, 2, C)            # (B, 2, C)
    out = jax.nn.sigmoid(y[:, 0, :] + y[:, 1, :]).astype(x.dtype)
    return out.reshape(B, C, 1, 1)


def reference(x, fc1_w, fc2_w):
    B, C, H, W = x.shape
    xf = x.astype(jnp.float32)
    avg = jnp.mean(xf, axis=(2, 3))
    mx = jnp.max(xf, axis=(2, 3))

    def mlp(v):
        return jnp.maximum(v @ fc1_w.T, 0.0) @ fc2_w.T

    return jax.nn.sigmoid(mlp(avg) + mlp(mx)).reshape(B, C, 1, 1)


def _check(name, out, ref, atol):
    assert out.shape == ref.shape, name
    assert jnp.allclose(out.astype(jnp.float32), ref, atol=atol, rtol=atol), f"mismatch: {name}"


if __name__ == "__main__":
    key = jax.random.PRNGKey(0)
    kx1, kx2, kx3, kx4, k1, k2 = jax.random.split(key, 6)

    B, C, reduction = 2, 64, 16
    hidden = C // reduction  # 4

    # PyTorch Linear layout (out_features, in_features).
    fc1_w = jax.random.uniform(k1, (hidden, C), jnp.float32, -1.0, 1.0) / jnp.sqrt(C)
    fc2_w = jax.random.uniform(k2, (C, hidden), jnp.float32, -1.0, 1.0) / jnp.sqrt(hidden)

    # Case 1: 16x16, explicit s_tile=128 -> streaming path, aligned (no mask).
    x1 = jax.random.normal(kx1, (B, C, 16, 16), dtype=jnp.float32)
    out1 = jax.block_until_ready(channel_attention(x1, fc1_w, fc2_w, s_tile=128))
    _check("streaming/aligned", out1, reference(x1, fc1_w, fc2_w), 1e-5)

    # Case 2: ragged 14x14 (S=196) -> single-tile path with exact-width tail read.
    x2 = jax.random.normal(kx2, (B, C, 14, 14), dtype=jnp.float32)
    out2 = jax.block_until_ready(channel_attention(x2, fc1_w, fc2_w))
    _check("single-tile/ragged", out2, reference(x2, fc1_w, fc2_w), 1e-5)

    # Case 3: bf16 streaming input (upcast per chunk inside the kernel).
    x3 = jax.random.normal(kx3, (B, C, 14, 14), dtype=jnp.bfloat16)
    out3 = jax.block_until_ready(channel_attention(x3, fc1_w, fc2_w))
    _check("single-tile/bf16", out3, reference(x3, fc1_w, fc2_w), 1e-2)

    # Case 4: S=300 with s_tile=256 -> streaming path, masked straddling chunk
    # plus a fully out-of-range chunk that is skipped at trace time.
    x4 = jax.random.normal(kx4, (B, C, 15, 20), dtype=jnp.float32)
    out4 = jax.block_until_ready(channel_attention(x4, fc1_w, fc2_w, s_tile=256))
    _check("streaming/masked-tail", out4, reference(x4, fc1_w, fc2_w), 1e-5)

    # Case 5: larger batch, tiny spatial -> single-tile path with bt>1 batch blocking.
    x5 = jax.random.normal(kx1, (8, C, 8, 8), dtype=jnp.float32)
    out5 = jax.block_until_ready(channel_attention(x5, fc1_w, fc2_w))
    _check("single-tile/batched", out5, reference(x5, fc1_w, fc2_w), 1e-5)

    print("KERNEL_OK")
</pallas_src>

<mosaic_0001>
module attributes {stable_mosaic.version = 11 : i64} {
  func.func @_pool_kernel_multi(%arg0: i32, %arg1: i32, %arg2: memref<1x64x128xf32, #tpu.memory_space<vmem>>, %arg3: memref<1x64x2xf32, #tpu.memory_space<vmem>>, %arg4: memref<64x128xf32, #tpu.memory_space<vmem>>, %arg5: memref<64x128xf32, #tpu.memory_space<vmem>>) attributes {dimension_semantics = [#tpu.dimension_semantics<parallel>, #tpu.dimension_semantics<arbitrary>], iteration_bounds = array<i64: 2, 2>, scalar_prefetch = 0 : i64, scratch_operands = 2 : i64, tpu.core_type = #tpu.core_type<tc>, window_params = [{transform_indices = @transform_0, window_bounds = array<i64: 1, 64, 128>}, {transform_indices = @transform_1, window_bounds = array<i64: 1, 64, 2>}]} {
    %c0_i32 = arith.constant 0 : i32
    %0 = arith.cmpi eq, %arg1, %c0_i32 : i32
    %1 = arith.extui %0 : i1 to i32
    %c0_i32_0 = arith.constant 0 : i32
    %2 = arith.cmpi ne, %1, %c0_i32_0 : i32
    scf.if %2 {
      %cst = arith.constant 0.000000e+00 : f32
      %14 = vector.broadcast %cst : f32 to vector<64x128xf32>
      %c0_12 = arith.constant 0 : index
      %c0_13 = arith.constant 0 : index
      %15 = vector.load %arg4[%c0_12, %c0_13] : memref<64x128xf32, #tpu.memory_space<vmem>>, vector<64x128xf32>
      tpu.vector_store %arg4[%c0_12, %c0_13], %14 {strides = array<i32>} : memref<64x128xf32, #tpu.memory_space<vmem>>, vector<64x128xf32>,
      %cst_14 = arith.constant 0xFF800000 : f32
      %16 = vector.broadcast %cst_14 : f32 to vector<64x128xf32>
      %c0_15 = arith.constant 0 : index
      %c0_16 = arith.constant 0 : index
      %17 = vector.load %arg5[%c0_15, %c0_16] : memref<64x128xf32, #tpu.memory_space<vmem>>, vector<64x128xf32>
      tpu.vector_store %arg5[%c0_15, %c0_16], %16 {strides = array<i32>} : memref<64x128xf32, #tpu.memory_space<vmem>>, vector<64x128xf32>,
    } else {
    }
    %c0 = arith.constant 0 : index
    %c0_1 = arith.constant 0 : index
    %3 = vector.load %arg4[%c0, %c0_1] : memref<64x128xf32, #tpu.memory_space<vmem>>, vector<64x128xf32>
    %c0_2 = arith.constant 0 : index
    %c0_3 = arith.constant 0 : index
    %4 = vector.load %arg5[%c0_2, %c0_3] : memref<64x128xf32, #tpu.memory_space<vmem>>, vector<64x128xf32>
    %c0_4 = arith.constant 0 : index
    %c0_5 = arith.constant 0 : index
    %c0_6 = arith.constant 0 : index
    %5 = vector.load %arg2[%c0_4, %c0_5, %c0_6] : memref<1x64x128xf32, #tpu.memory_space<vmem>>, vector<1x64x128xf32>
    %6 = vector.shape_cast %5 : vector<1x64x128xf32> to vector<64x128xf32>
    %7 = arith.addf %3, %6 : vector<64x128xf32>
    %8 = arith.maximumf %4, %6 : vector<64x128xf32>
    %c0_7 = arith.constant 0 : index
    %c0_8 = arith.constant 0 : index
    %9 = vector.load %arg4[%c0_7, %c0_8] : memref<64x128xf32, #tpu.memory_space<vmem>>, vector<64x128xf32>
    tpu.vector_store %arg4[%c0_7, %c0_8], %7 {strides = array<i32>} : memref<64x128xf32, #tpu.memory_space<vmem>>, vector<64x128xf32>,
    %c0_9 = arith.constant 0 : index
    %c0_10 = arith.constant 0 : index
    %10 = vector.load %arg5[%c0_9, %c0_10] : memref<64x128xf32, #tpu.memory_space<vmem>>, vector<64x128xf32>
    tpu.vector_store %arg5[%c0_9, %c0_10], %8 {strides = array<i32>} : memref<64x128xf32, #tpu.memory_space<vmem>>, vector<64x128xf32>,
    %c1_i32 = arith.constant 1 : i32
    %11 = arith.cmpi eq, %arg1, %c1_i32 : i32
    %12 = arith.extui %11 : i1 to i32
    %c0_i32_11 = arith.constant 0 : i32
    %13 = arith.cmpi ne, %12, %c0_i32_11 : i32
    scf.if %13 {
      %c0_12 = arith.constant 0 : index
      %c0_13 = arith.constant 0 : index
      %14 = vector.load %arg4[%c0_12, %c0_13] : memref<64x128xf32, #tpu.memory_space<vmem>>, vector<64x128xf32>
      %cst = arith.constant dense<0.000000e+00> : vector<64xf32>
      %15 = vector.multi_reduction <add>, %14, %cst [1] : vector<64x128xf32> to vector<64xf32>
      %16 = vector.shape_cast %15 : vector<64xf32> to vector<64x1xf32>
      %cst_14 = arith.constant 3.906250e-03 : f32
      %17 = vector.broadcast %cst_14 : f32 to vector<64x1xf32>
      %18 = arith.mulf %16, %17 : vector<64x1xf32>
      %c0_15 = arith.constant 0 : index
      %c0_16 = arith.constant 0 : index
      %19 = vector.load %arg5[%c0_15, %c0_16] : memref<64x128xf32, #tpu.memory_space<vmem>>, vector<64x128xf32>
      %cst_17 = arith.constant dense<0xFF800000> : vector<64xf32>
      %20 = vector.multi_reduction <maximumf>, %19, %cst_17 [1] : vector<64x128xf32> to vector<64xf32>
      %21 = vector.shape_cast %20 : vector<64xf32> to vector<64x1xf32>
      %22 = tpu.concatenate %18, %21 in 1 : vector<64x1xf32>, vector<64x1xf32> -> vector<64x2xf32>
      %c0_18 = arith.constant 0 : index
      %c0_19 = arith.constant 0 : index
      %c0_20 = arith.constant 0 : index
      %23 = vector.load %arg3[%c0_18, %c0_19, %c0_20] : memref<1x64x2xf32, #tpu.memory_space<vmem>>, vector<1x64x2xf32>
      %24 = vector.shape_cast %23 : vector<1x64x2xf32> to vector<64x2xf32>
      %25 = vector.shape_cast %22 : vector<64x2xf32> to vector<1x64x2xf32>
      tpu.vector_store %arg3[%c0_18, %c0_19, %c0_20], %25 {strides = array<i32>} : memref<1x64x2xf32, #tpu.memory_space<vmem>>, vector<1x64x2xf32>,
    } else {
    }
    return
  }
  func.func @transform_0(%arg0: i32, %arg1: i32) -> (i32, i32, i32) {
    %c0_i32 = arith.constant 0 : i32
    %c0_i32_0 = arith.constant 0 : i32
    return %arg0, %c0_i32, %arg1 : i32, i32, i32
  }
  func.func @transform_1(%arg0: i32, %arg1: i32) -> (i32, i32, i32) {
    %c0_i32 = arith.constant 0 : i32
    %c0_i32_0 = arith.constant 0 : i32
    %c0_i32_1 = arith.constant 0 : i32
    return %arg0, %c0_i32, %c0_i32_0 : i32, i32, i32
  }
}

</mosaic_0001>

<bundles_post_ra>
// kernel: tpu_custom_call.1
= control target key start
LH: loop header
LB: loop body
LE: loop exit
PB: predicated region body
PF: predicated region fallthrough
CT: control target
= control target key end

     0   :  { %6 = vsyncpa [#allocation5], 0  ;;  %s781_s0 = inlined_call_operand.hbm [shape: f32[2,64,256], index: 0, kind: input, shape index: {}]   ;;  %s782_s1 = inlined_call_operand.vmem [shape: f32[2,64,2], index: 1, kind: output, shape index: {}]  }
   0x1   :  { %8 = vsyncpa [#allocation5 + $0x1], 0  ;;  %s592_s6 = smov 0   ;;  %s594_s7 = smov 0  }
   0x2   :  { %s596_s8 = smov 0   ;;  %s598_s9 = smov 0  }
   0x3   :  { %s600_s10 = smov 0   ;;  %s602_s11 = smov 0  }
   0x4   :  { %s604_s12 = smov 0   ;;  %s606_s13 = smov 0  }
   0x5 LB: > { %s386_s14 = sadd.s32 4294967295, %s574_s13   ;;  %s23_s15 = sadd.s32 1, %s566_s11  ;;  %s574_s13 = sphi %s606_s13, %s14_s13   ;;  %s570_s12 = sphi %s604_s12, %s793_s12   ;;  %s566_s11 = sphi %s602_s11, %s792_s11   ;;  %s562_s10 = sphi %s600_s10, %s791_s10   ;;  %s558_s9 = sphi %s598_s9, %s790_s9   ;;  %s554_s8 = sphi %s596_s8, %s789_s8   ;;  %s550_s7 = sphi %s594_s7, %s788_s7   ;;  %s546_s6 = sphi %s592_s6, %s787_s6  }
   0x6   : > { %p24_p0 = scmp.ge.s32.totalorder %s23_s15, 2  ;;  %s26_s16 = sadd.s32 1, %s570_s12 }
   0x7   : > { %s35_s17 = sadd.s32 1, %s554_s8  ;;  %p42_p1 = scmp.ne.s32.totalorder %s554_s8, %s550_s7 }
   0x8   : > { %s795_s15 = smov (%p24_p0, %s23_s15), 0  ;;  %s797_s16 = smov (!%p24_p0, %s26_s16), %s570_s12 }
   0x9   : > { %s31_s18 = ssub.s32 %s566_s11, %s795_s15  ;;  %p43_p2 = scmp.eq.s32.totalorder %s574_s13, 0 }
   0xa   : > { %p28_p3 = scmp.ge.s32.totalorder %s797_s16, 2  ;;  %p48_p4 = scmp.ne.s32.totalorder %s550_s7, %s546_s6 }
   0xb   : > { %p643_p5 = por %p43_p2, %p42_p1  ;;  %p49_p6 = scmp.eq.s32.totalorder %s386_s14, 0 }
   0xc   : > { %s799_s16 = smov (%p28_p3, %s797_s16), 0  ;;  %p408_p8 = scmp.lt.s32.totalorder %s574_s13, 4 }
   0xd   : > { %p649_p7 = por %p49_p6, %p48_p4  ;;  %s30_s21 = ssub.s32 %s570_s12, %s799_s16 }
   0xe   : > { %s32_s22 = sor.u32 %s31_s18, %s30_s21  ;;  %s98_s23 = sand.u32 1, %s554_s8  }
   0xf   : > { %p33_p9 = scmp.eq.s32.totalorder %s32_s22, 0  ;;  %s390_s24 = sshll.u32 %s98_s23, 6 }
  0x10   : > { %s391_s25 = sshll.u32 %s570_s12, 4  ;;  %s102_s29 = scalar_lea.vmem [#allocation4], %s390_s24 }
  0x11   : > { %s659_s26 = scalar_select %p33_p9, %s554_s8, %s35_s17  }
  0x12   : > { %s107_s27 = sadd.s32 %s566_s11, %s391_s25  ;;  %s110_s30 = sshll.u32 %s102_s29, 4  ;;  %s667_s30 = int_to_ptr.vmem [resolvable:$true] %s110_s30 }
  0x13   : > { %s392_s28 = sshll.u32 %s107_s27, 7  ;;  %p673_p10 = pnand %p408_p8, %p643_p5 }
  0x14   : > { %s665_s4 = scalar_lea.hbm %s781_s0, %s392_s28  ;;  %s678_s6 = scalar_lea.sflag [#allocation5], %s98_s23 }
  0x15   : > { %s478_s14 = scalar_lea.hbm %s665_s4, 1024  ;;  %p480_p13 = pneg %p673_p10 }
  0x16   : > { %p479_p12 = scmp.ne.s32.totalorder %s665_s4, %s478_s14  ;;  %s483_s19 = scalar_lea.hbm %s781_s0, 4096 }
  0x17   : > { %p484_p2 = scmp.lt.u32.totalorder %s665_s4, %s781_s0  ;;  %p485_p3 = scmp.lt.u32.totalorder %s483_s19, %s478_s14 }
  0x18   : > { %p481_p0 = pnand %p480_p13, %p479_p12  ;;  %p487_p5 = scmp.lt.u32.totalorder %s478_s14, %s665_s4 }
  0x19   : > { %p486_p4 = por %p485_p3, %p484_p2 }
  0x1a   : > { %p482_p1 = pneg %p481_p0 }
  0x1b   : > { %p488_p6 = por %p487_p5, %p486_p4 }
  0x1d   : > { %p489_p8 = pnand %p488_p6, %p482_p1 }
  0x1f   : > { %492 = shalt.err (!%p489_p8)
}
  0x20   : > { %s493_s23 = scalar_lea.vmem %s667_s30, 1024  ;;  %s576_s24 = smov [#allocation4]  }
  0x21   : > { %p494_p9 = scmp.ne.s32.totalorder %s667_s30, %s493_s23  ;;  %s498_s25 = sshll.u32 %s576_s24, 4  ;;  %s499_s25 = int_to_ptr.vmem [resolvable:$false] %s498_s25 }
  0x22   : > { %s500_s27 = scalar_lea.vmem %s499_s25, 2048  ;;  %p501_p11 = scmp.lt.s32.totalorder %s667_s30, %s499_s25 }
  0x23   : > { %p496_p12 = pnand %p494_p9, %p480_p13  ;;  %p502_p2 = scmp.lt.s32.totalorder %s500_s27, %s493_s23 }
  0x25   : > { %p497_p0 = pneg %p496_p12  ;;  %p503_p3 = por %p502_p2, %p501_p11 }
  0x27   : > { %p504_p4 = pnand %p503_p3, %p497_p0 }
  0x29   : > { %507 = shalt.err (!%p504_p4)
}
  0x2a   : > { %s577_s28 = smov 256   ;;  %s578_s29 = smov 128  }
  0x2b   : > { %s579_s2 = smov 8   ;;  %p118_p13 = scmp.lt.s32.totalorder %s574_s13, 5 }
  0x2c   : > { %407 = dma.hbm_to_vmem [thread:$0]  (!%p673_p10), %s665_s4, 1024, %s667_s30, %s678_s6, %s577_s28, %s578_s29, %s579_s2  }
  0x2d   : > { %p786_p1 = scmp.ge.s32.totalorder %s574_s13, 1 }
  0x2f   : > { %p119_p5 = pnand %p786_p1, %p118_p13 }
  0x30   : > { %s124_s3 = sand.u32 (!%p119_p5), 1, %s550_s7  }
  0x31   : > { %122 = sbr.rel (%p119_p5) target bundleno = 253 (0xfd), region = 24  ;;  %s394_s14 = sshll.u32 (!%p119_p5), %s124_s3, 6 }
  0x32   : > { %s125_s17 = scalar_lea.sflag (!%p119_p5), [#allocation5], %s124_s3  ;;  %s710_s18 = scalar_lea.vmem (!%p119_p5), [#allocation4], %s394_s14 }
  0x38   : > { %541 = dma.done.wait (%p649_p7), %s125_s17, 1024  }
  0x39   : > { %543 = vsyncadd (%p649_p7), %s125_s17, 4294966272  ;;  %p147_p11 = scmp.lt.s32.totalorder %s562_s10, 1  ;;  %p397_p10 = scmp.ne.s32.totalorder %s558_s9, 0 }
  0x3a   : > { %v580_v0 = vmov (!%p397_p10), 0.0   ;;  %v581_v1 = vmov (!%p397_p10), -inf  }
  0x3b   : > { %s801_s10 = smov (!%p147_p11, %s562_s10), 1  ;;  %155 = sbr.rel (%p397_p10) target bundleno = 68 (0x44), region = 32 }
  0x3c   : > { %s401_s30 = sshll.u32 %s801_s10, 6  ;;  %156 = vst [vmem:[#allocation2] sm:$0xff] (!%p397_p10), %v580_v0  ;;  %157 = vst [vmem:[#allocation2 + $0x8] sm:$0xff] (!%p397_p10), %v580_v0 }
  0x3d   : > { %s721_s6 = scalar_lea.vmem %s782_s1, %s401_s30  ;;  %158 = vst [vmem:[#allocation2 + $0x10] sm:$0xff] (!%p397_p10), %v580_v0  ;;  %159 = vst [vmem:[#allocation2 + $0x18] sm:$0xff] (!%p397_p10), %v580_v0 }
  0x3e   : > { %160 = vst [vmem:[#allocation2 + $0x20] sm:$0xff] (!%p397_p10), %v580_v0  ;;  %161 = vst [vmem:[#allocation2 + $0x28] sm:$0xff] (!%p397_p10), %v580_v0 }
  0x3f   : > { %162 = vst [vmem:[#allocation2 + $0x30] sm:$0xff] (!%p397_p10), %v580_v0  ;;  %163 = vst [vmem:[#allocation2 + $0x38] sm:$0xff] (!%p397_p10), %v580_v0 }
  0x40   : > { %164 = vst [vmem:[#allocation3] sm:$0xff] (!%p397_p10), %v581_v1  ;;  %165 = vst [vmem:[#allocation3 + $0x8] sm:$0xff] (!%p397_p10), %v581_v1 }
  0x41   : > { %166 = vst [vmem:[#allocation3 + $0x10] sm:$0xff] (!%p397_p10), %v581_v1  ;;  %167 = vst [vmem:[#allocation3 + $0x18] sm:$0xff] (!%p397_p10), %v581_v1 }
  0x42   : > { %168 = vst [vmem:[#allocation3 + $0x20] sm:$0xff] %v581_v1  ;;  %169 = vst [vmem:[#allocation3 + $0x28] sm:$0xff] %v581_v1 }
  0x43   : > { %170 = vst [vmem:[#allocation3 + $0x30] sm:$0xff] %v581_v1  ;;  %171 = vst [vmem:[#allocation3 + $0x38] sm:$0xff] %v581_v1 }
  0x44 PF: > { %v188_v3 = vld [vmem:[%s710_s18] sm:$0xff]  ;;  %v189_v6 = vld [vmem:[%s710_s18 + $0x8] sm:$0xff]  ;;  %v190_v8 = vld [vmem:[%s710_s18 + $0x10] sm:$0xff]  ;;  %p398_p7 = scmp.ne.s32.totalorder %s558_s9, 1 }
  0x45   : > { %v172_v2 = vld [vmem:[#allocation2] sm:$0xff]  ;;  %v173_v4 = vld [vmem:[#allocation2 + $0x8] sm:$0xff]  ;;  %v191_v12 = vld [vmem:[%s710_s18 + $0x18] sm:$0xff]  ;;  %vm288_vm0 = vcmask (!%p398_p7), 7168   ;;  %vm297_vm1 = vcmask (!%p398_p7), 15360  }
  0x46   : > { %v196_v5 = vadd.f32 %v188_v3, %v172_v2  ;;  %v174_v7 = vld [vmem:[#allocation2 + $0x10] sm:$0xff]  ;;  %v197_v9 = vadd.f32 %v189_v6, %v173_v4  ;;  %v175_v11 = vld [vmem:[#allocation2 + $0x18] sm:$0xff]  ;;  %v192_v15 = vld [vmem:[%s710_s18 + $0x20] sm:$0xff] }
  0x47   : > { %v198_v10 = vadd.f32 %v190_v8, %v174_v7  ;;  %v176_v13 = vld [vmem:[#allocation2 + $0x20] sm:$0xff]  ;;  %v199_v14 = vadd.f32 %v191_v12, %v175_v11  ;;  %v177_v16 = vld [vmem:[#allocation2 + $0x28] sm:$0xff]  ;;  %v194_v21 = vld [vmem:[%s710_s18 + $0x30] sm:$0xff] }
  0x48   : > { %212 = vst [vmem:[#allocation2] sm:$0xff] %v196_v5  ;;  %v193_v17 = vld [vmem:[%s710_s18 + $0x28] sm:$0xff]  ;;  %213 = vst [vmem:[#allocation2 + $0x8] sm:$0xff] %v197_v9  ;;  %v200_v18 = vadd.f32 %v192_v15, %v176_v13  ;;  %v178_v20 = vld [vmem:[#allocation2 + $0x30] sm:$0xff] }
  0x49   : > { %214 = vst [vmem:[#allocation2 + $0x10] sm:$0xff] %v198_v10  ;;  %v201_v19 = vadd.f32 %v193_v17, %v177_v16  ;;  %v179_v22 = vld [vmem:[#allocation2 + $0x38] sm:$0xff]  ;;  %215 = vst [vmem:[#allocation2 + $0x18] sm:$0xff] %v199_v14  ;;  %v202_v23 = vadd.f32 %v194_v21, %v178_v20  ;;  %v180_v25 = vld [vmem:[#allocation3] sm:$0xff] }
  0x4a   : > { %v195_v24 = vld [vmem:[%s710_s18 + $0x38] sm:$0xff]  ;;  %v181_v26 = vld [vmem:[#allocation3 + $0x8] sm:$0xff]  ;;  %216 = vst [vmem:[#allocation2 + $0x20] sm:$0xff] %v200_v18  ;;  %v204_v28 = vmax.f32 %v180_v25, %v188_v3  ;;  %v182_v30 = vld [vmem:[#allocation3 + $0x10] sm:$0xff]  ;;  %231 = sbr.rel (%p398_p7) target bundleno = 253 (0xfd), region = 36 }
  0x4b   : > { %217 = vst [vmem:[#allocation2 + $0x28] sm:$0xff] %v201_v19  ;;  %v203_v27 = vadd.f32 %v195_v24, %v179_v22  ;;  %v205_v29 = vmax.f32 %v181_v26, %v189_v6  ;;  %v183_v31 = vld [vmem:[#allocation3 + $0x18] sm:$0xff]  ;;  %v184_v32 = vld [vmem:[#allocation3 + $0x20] sm:$0xff]  ;;  %218 = vst [vmem:[#allocation2 + $0x30] sm:$0xff] %v202_v23  ;;  %v206_v33 = vmax.f32 %v182_v30, %v190_v8 }
  0x4c   : > { %v207_v34 = vmax.f32 %v183_v31, %v191_v12  ;;  %v208_v35 = vmax.f32 %v184_v32, %v192_v15  ;;  %v185_v36 = vld [vmem:[#allocation3 + $0x28] sm:$0xff]  ;;  %v186_v37 = vld [vmem:[#allocation3 + $0x30] sm:$0xff]  ;;  %v187_v38 = vld [vmem:[#allocation3 + $0x38] sm:$0xff]  ;;  %220 = vst [vmem:[#allocation3] sm:$0xff] %v204_v28 }
  0x4d   : > { %219 = vst [vmem:[#allocation2 + $0x38] sm:$0xff] %v203_v27  ;;  %221 = vst [vmem:[#allocation3 + $0x8] sm:$0xff] %v205_v29  ;;  %v209_v39 = vmax.f32 %v185_v36, %v193_v17  ;;  %v210_v40 = vmax.f32 %v186_v37, %v194_v21  ;;  %v211_v41 = vmax.f32 %v187_v38, %v195_v24 }
  0x4e   : > { %222 = vst [vmem:[#allocation3 + $0x10] sm:$0xff] %v206_v33  ;;  %223 = vst [vmem:[#allocation3 + $0x18] sm:$0xff] %v207_v34 }
  0x4f   : > { %224 = vst [vmem:[#allocation3 + $0x20] sm:$0xff] %v208_v35  ;;  %225 = vst [vmem:[#allocation3 + $0x28] sm:$0xff] %v209_v39  ;;  %v232_v43 = vld [vmem:[#allocation2] sm:$0xff] (!%p398_p7)  ;;  %v233_v45 = vld [vmem:[#allocation2 + $0x8] sm:$0xff] (!%p398_p7) }
  0x50   : > { %226 = vst [vmem:[#allocation3 + $0x30] sm:$0xff] %v210_v40  ;;  %227 = vst [vmem:[#allocation3 + $0x38] sm:$0xff] %v211_v41  ;;  %v234_v42 = vld [vmem:[#allocation2 + $0x10] sm:$0xff] (!%p398_p7)  ;;  %240 = vadd.xlane.f32.xlu0 (!%p398_p7), %v232_v43  ;;  %v235_v44 = vld [vmem:[#allocation2 + $0x18] sm:$0xff] (!%p398_p7) }
  0x51   : > { %244 = vadd.xlane.f32.xlu1 %v234_v42  ;;  %v236_v47 = vld [vmem:[#allocation2 + $0x20] sm:$0xff] }
  0x52   : > { %v237_v46 = vld [vmem:[#allocation2 + $0x28] sm:$0xff]  ;;  %v238_v49 = vld [vmem:[#allocation2 + $0x30] sm:$0xff] }
  0x53   : > { %v264_v51 = vld [vmem:[#allocation3] sm:$0xff] }
  0x54   : > { %242 = vadd.xlane.f32.xlu0 %v233_v45  ;;  %v239_v48 = vld [vmem:[#allocation2 + $0x38] sm:$0xff]  ;;  %v265_v50 = vld [vmem:[#allocation3 + $0x8] sm:$0xff] }
  0x55   : > { %246 = vadd.xlane.f32.xlu1 %v235_v44  ;;  %v267_v52 = vld [vmem:[#allocation3 + $0x18] sm:$0xff]  ;;  %v266_v53 = vld [vmem:[#allocation3 + $0x10] sm:$0xff] }
  0x56   : > { %v269_v54 = vld [vmem:[#allocation3 + $0x28] sm:$0xff]  ;;  %v268_v55 = vld [vmem:[#allocation3 + $0x20] sm:$0xff] }
  0x57   : > { %v271_v56 = vld [vmem:[#allocation3 + $0x38] sm:$0xff]  ;;  %v270_v57 = vld [vmem:[#allocation3 + $0x30] sm:$0xff] }
  0x58   : > { %248 = vadd.xlane.f32.xlu0 %v236_v47 }
  0x59   : > { %250 = vadd.xlane.f32.xlu1 %v237_v46 }
  0x5c   : > { %252 = vadd.xlane.f32.xlu0 %v238_v49 }
  0x5d   : > { %254 = vadd.xlane.f32.xlu1 %v239_v48 }
  0x60   : > { %272 = vmax.xlane.f32.xlu0 %v264_v51 }
  0x61   : > { %274 = vmax.xlane.f32.xlu1 %v265_v50 }
  0x64   : > { %276 = vmax.xlane.f32.xlu0 %v266_v53 }
  0x65   : > { %278 = vmax.xlane.f32.xlu1 %v267_v52 }
  0x68   : > { %280 = vmax.xlane.f32.xlu0 %v268_v55 }
  0x69   : > { %282 = vmax.xlane.f32.xlu1 %v269_v54 }
  0x6c   : > { %284 = vmax.xlane.f32.xlu0 %v270_v57 }
  0x6d   : > { %286 = vmax.xlane.f32.xlu1 %v271_v56 }
  0xdd   : > { %v241_v59 = vpop.xlane.xlu0 %240 }
  0xde   : > { %v245_v58 = vpop.xlane.xlu1 %244  ;;  %v256_v2 = vmul.f32 0.00390625, %v241_v59 }
  0xdf   : > { %v258_v8 = vmul.f32 0.00390625, %v245_v58 }
  0xe1   : > { %v243_v61 = vpop.xlane.xlu0 %242 }
  0xe2   : > { %v247_v60 = vpop.xlane.xlu1 %246  ;;  %v257_v3 = vmul.f32 0.00390625, %v243_v61 }
  0xe3   : > { %v259_v9 = vmul.f32 0.00390625, %v247_v60 }
  0xe5   : > { %v249_v63 = vpop.xlane.xlu0 %248 }
  0xe6   : > { %v251_v62 = vpop.xlane.xlu1 %250  ;;  %v260_v15 = vmul.f32 0.00390625, %v249_v63 }
  0xe7   : > { %v261_v14 = vmul.f32 0.00390625, %v251_v62 }
  0xe9   : > { %v253_v1 = vpop.xlane.xlu0 %252 }
  0xea   : > { %v255_v0 = vpop.xlane.xlu1 %254  ;;  %v262_v21 = vmul.f32 0.00390625, %v253_v1 }
  0xeb   : > { %v263_v20 = vmul.f32 0.00390625, %v255_v0 }
  0xed   : > { %v273_v5 = vpop.xlane.xlu0 %272 }
  0xee   : > { %v275_v4 = vpop.xlane.xlu1 %274  ;;  %v289_v7 = vsel %vm288_vm0, %v256_v2, %v273_v5 }
  0xef   : > { %v290_v6 = vsel %vm288_vm0, %v257_v3, %v275_v4  ;;  %298 = vst.msk [vmem:[%s721_s6] sm:$0xff] %vm297_vm1, %v289_v7 }
  0xf0   : > { %299 = vst.msk [vmem:[%s721_s6 + $0x8] sm:$0xff] %vm297_vm1, %v290_v6 }
  0xf1   : > { %v277_v11 = vpop.xlane.xlu0 %276 }
  0xf2   : > { %v279_v10 = vpop.xlane.xlu1 %278  ;;  %v291_v13 = vsel %vm288_vm0, %v258_v8, %v277_v11 }
  0xf3   : > { %v292_v12 = vsel %vm288_vm0, %v259_v9, %v279_v10  ;;  %300 = vst.msk [vmem:[%s721_s6 + $0x10] sm:$0xff] %vm297_vm1, %v291_v13 }
  0xf4   : > { %301 = vst.msk [vmem:[%s721_s6 + $0x18] sm:$0xff] %vm297_vm1, %v292_v12 }
  0xf5   : > { %v281_v17 = vpop.xlane.xlu0 %280 }
  0xf6   : > { %v283_v16 = vpop.xlane.xlu1 %282  ;;  %v293_v19 = vsel %vm288_vm0, %v260_v15, %v281_v17 }
  0xf7   : > { %v294_v18 = vsel %vm288_vm0, %v261_v14, %v283_v16  ;;  %302 = vst.msk [vmem:[%s721_s6 + $0x20] sm:$0xff] %vm297_vm1, %v293_v19 }
  0xf8   : > { %303 = vst.msk [vmem:[%s721_s6 + $0x28] sm:$0xff] %vm297_vm1, %v294_v18 }
  0xf9   : > { %v285_v23 = vpop.xlane.xlu0 %284 }
  0xfa   : > { %v287_v22 = vpop.xlane.xlu1 %286  ;;  %v295_v25 = vsel %vm288_vm0, %v262_v21, %v285_v23 }
  0xfb   : > { %v296_v24 = vsel %vm288_vm0, %v263_v20, %v287_v22  ;;  %304 = vst.msk [vmem:[%s721_s6 + $0x30] sm:$0xff] %vm297_vm1, %v295_v25 }
  0xfc   : > { %305 = vst.msk [vmem:[%s721_s6 + $0x38] sm:$0xff] %vm297_vm1, %v296_v24 }
  0xfd PF: > { %s14_s13 = sadd.s32 1, %s574_s13   ;;  %s787_s6 = smov %s550_s7 }
  0xfe   : > { %p11_p6 = scmp.ge.s32.totalorder %s14_s13, 6   ;;  %s788_s7 = smov %s554_s8 }
  0xff   : > { %s789_s8 = smov %s659_s26  ;;  %s790_s9 = smov %s566_s11 }
 0x100   : > { %s791_s10 = smov %s570_s12  ;;  %s792_s11 = smov %s795_s15 }
 0x101   : > { %s793_s12 = smov %s799_s16  ;;  %13 = sbr.rel (!%p11_p6) target bundleno = 5 (0x5), region = 72 }
 0x108   :  { %327 = vsyncpa [#allocation5], 1 }
 0x109   :  { %329 = vsyncpa [#allocation5 + $0x1], 1 }

</bundles_post_ra>
